<compile_context>
chip_gen: v6e
topology: v6e:2x2x1
jax: 0.10.0
libtpu: 0.0.40
codegen_flags: <defaults>
</compile_context>

<pallas_src>
import functools

import jax
import jax.numpy as jnp
from jax.experimental import pallas as pl
from jax.experimental.pallas import tpu as pltpu

N_ELECTRODES = 7
DATA_INPUT_INDICES = (2, 3)  # configs['input_indices'] for the ring task (2 data inputs)
CONTROL_INDICES = tuple(i for i in range(N_ELECTRODES) if i not in DATA_INPUT_INDICES)
HIDDEN = 90                  # brains-py surrogate-model default hidden width
HIDDEN_PAD = 128             # padded hidden width (full vreg lanes / MXU tile)
N_HIDDEN_LAYERS = 4          # the four 90x90 (padded 128x128) inner layers
AMPLIFICATION = 28.5         # device amplification factor (synthetic, deterministic)

# Data/control electrode voltage ranges (synthetic but realistic for a DNPU device).
DATA_V_MIN, DATA_V_MAX = -1.2, 0.6
CTRL_V_MIN, CTRL_V_MAX = -1.2, 0.6

DEFAULT_BATCH_TILE = 2048    # rows per grid step (sweepable: 2048/4096)

# Packed side-parameter row layout (one (8,128) f32 vreg tile).
_ROW_W1 = 0      # rows 0..1 : W1_eff (2, 128)
_ROW_B1 = 2      # row  2    : b1_eff (1, 128)
_ROW_BH = 3      # rows 3..6 : b2..b5 (4, 128)
_ROW_W6 = 7      # row  7    : W6_eff (1, 128)


def _round_up(n, m):
    return ((n + m - 1) // m) * m


def _choose_tile(batch, batch_tile):
    """Pick (tile_rows, padded_rows). Multi-tile tiles are 128-lane aligned."""
    b8 = _round_up(max(batch, 1), 8)
    if b8 <= 256:
        # Tiny batch: a single tile; block dims equal the full (padded) array.
        return b8, b8
    # Aim for >= 2 lane-aligned tiles (keeps both v7x TensorCores busy), but
    # never exceed the requested batch tile.
    half = _round_up((b8 + 1) // 2, 128)
    tb = min(_round_up(batch_tile, 128), half)
    padded = _round_up(b8, tb)
    return tb, padded


# ---------------------------------------------------------------------------
# Pallas kernel: fused (folded) surrogate MLP for one batch tile.
# ---------------------------------------------------------------------------
def dnpu_mlp_kernel(x_ref, side_ref, wh_ref, b6_ref, out_ref):
    """x (TB, 2) -> out (1, TB). Input transform / control voltages / amp folded."""
    x = x_ref[...]                               # (TB, 2)  f32
    side = side_ref[...]                         # (8, 128) f32, one vreg tile
    w1 = side[_ROW_W1:_ROW_W1 + 2, :]            # (2, 128)
    b1 = side[_ROW_B1:_ROW_B1 + 1, :]            # (1, 128)
    w6 = side[_ROW_W6:_ROW_W6 + 1, :]            # (1, 128)

    # Layer 1 (K=2): VPU broadcast multiply-add; avoids a degenerate MXU pass.
    h = x[:, 0:1] * w1[0:1, :] + x[:, 1:2] * w1[1:2, :] + b1
    h = jnp.maximum(h, 0.0).astype(jnp.bfloat16)               # (TB, 128) bf16

    # Hidden layers 2..5: bf16 MXU matmuls, f32 accumulation, f32 bias+ReLU,
    # activations round-trip as bf16 (half the VMEM bytes for the intermediate).
    for j in range(N_HIDDEN_LAYERS):
        a = jnp.dot(h, wh_ref[j], preferred_element_type=jnp.float32)
        a = jnp.maximum(a + side[_ROW_BH + j:_ROW_BH + j + 1, :], 0.0)
        h = a.astype(jnp.bfloat16) if j < N_HIDDEN_LAYERS - 1 else a

    # Final 128 -> 1 layer (amplification folded into w6/b6): VPU multiply +
    # lane reduction. Store lane-dense (1, TB).
    y = jnp.sum(h * w6, axis=-1) + b6_ref[0, 0]                 # (TB,)
    out_ref[...] = y[None, :].astype(out_ref.dtype)


# ---------------------------------------------------------------------------
# Parameters: raw (module-like) params + kernel-ready folded/padded params.
# ---------------------------------------------------------------------------
def init_params(key):
    """Deterministic synthetic parameters with the shapes the DNPU implies."""
    keys = jax.random.split(key, 13)
    dims = [N_ELECTRODES, HIDDEN, HIDDEN, HIDDEN, HIDDEN, HIDDEN, 1]
    weights, biases = [], []
    for i in range(6):
        fan_in = dims[i]
        w = jax.random.normal(keys[i], (dims[i], dims[i + 1]), jnp.float32)
        w = w * (1.0 / jnp.sqrt(jnp.float32(fan_in)))
        weights.append(w)
        b = 0.1 * jax.random.normal(keys[6 + i], (1, dims[i + 1]), jnp.float32)
        biases.append(b)

    # Learnable control voltages for the 5 control electrodes (DNPU "bias").
    cv = jax.random.uniform(keys[12], (len(CONTROL_INDICES),), jnp.float32,
                            minval=CTRL_V_MIN, maxval=CTRL_V_MAX)

    # Input transform: x in [-1, 1] -> data-electrode voltage range.
    in_scale = jnp.full((len(DATA_INPUT_INDICES),),
                        (DATA_V_MAX - DATA_V_MIN) / 2.0, jnp.float32)
    in_offset = jnp.full((len(DATA_INPUT_INDICES),),
                         DATA_V_MIN + (DATA_V_MAX - DATA_V_MIN) / 2.0, jnp.float32)

    amp = jnp.full((1, 1), AMPLIFICATION, jnp.float32)
    return {
        "weights": weights,
        "biases": biases,
        "control_voltages": cv,
        "in_scale": in_scale,
        "in_offset": in_offset,
        "amplification": amp,
    }


def prepare_kernel_params(params):
    """Fold transform/control-voltages/amp into W1/b1/W6/b6, pad 90->128, pack."""
    w = params["weights"]
    b = params["biases"]
    in_scale = params["in_scale"]
    in_offset = params["in_offset"]
    cv = params["control_voltages"]
    amp = params["amplification"][0, 0]
    pad = HIDDEN_PAD - HIDDEN

    data_idx = jnp.asarray(DATA_INPUT_INDICES)
    ctrl_idx = jnp.asarray(CONTROL_INDICES)
    w1_data = w[0][data_idx, :]                              # (2, 90)
    w1_ctrl = w[0][ctrl_idx, :]                              # (5, 90)
    b1 = b[0].reshape(-1)                                    # (90,)

    # W1_eff / b1_eff: input transform + electrode scatter + control voltages.
    w1_eff = in_scale[:, None] * w1_data                     # (2, 90)
    b1_eff = in_offset @ w1_data + cv @ w1_ctrl + b1         # (90,)
    w1_eff = jnp.pad(w1_eff, ((0, 0), (0, pad))).astype(jnp.float32)      # (2, 128)
    b1_eff = jnp.pad(b1_eff, ((0, pad),))[None, :].astype(jnp.float32)    # (1, 128)

    # Hidden layers 2..5, packed and zero-padded; bf16 for the MXU.
    wh = jnp.stack([jnp.pad(w[i], ((0, pad), (0, pad))) for i in range(1, 5)])
    wh = wh.astype(jnp.bfloat16)                                          # (4,128,128)
    bh = jnp.stack([jnp.pad(b[i].reshape(-1), ((0, pad),)) for i in range(1, 5)])
    bh = bh.astype(jnp.float32)                                           # (4, 128)

    # Final layer with amplification folded in; as a lane-row for VPU reduce.
    w6_eff = (amp * w[5][:, 0])                                           # (90,)
    w6_eff = jnp.pad(w6_eff, ((0, pad),))[None, :].astype(jnp.float32)    # (1, 128)
    b6_eff = (amp * b[5]).reshape(1, 1).astype(jnp.float32)               # (1, 1)

    # Pack all small f32 side params into exactly one (8, 128) vreg tile:
    # rows 0-1 = W1_eff, row 2 = b1_eff, rows 3-6 = b2..b5, row 7 = W6_eff.
    side = jnp.concatenate([w1_eff, b1_eff, bh, w6_eff], axis=0)          # (8, 128)

    return {"side": side, "wh": wh, "b6": b6_eff}


# ---------------------------------------------------------------------------
# Forward wrapper.
# ---------------------------------------------------------------------------
@functools.partial(jax.jit, static_argnames=("batch_tile",))
def dnpu_forward(x, kparams, batch_tile=DEFAULT_BATCH_TILE):
    """Full DefaultCustomModel forward: x (B, 2) -> y (B, 1)."""
    x = x.astype(jnp.float32)
    batch = x.shape[0]

    tb, padded = _choose_tile(batch, batch_tile)
    if padded != batch:
        x = jnp.pad(x, ((0, padded - batch), (0, 0)))
    n_tiles = padded // tb

    const2 = lambda i: (0, 0)
    const3 = lambda i: (0, 0, 0)

    out = pl.pallas_call(
        dnpu_mlp_kernel,
        out_shape=jax.ShapeDtypeStruct((1, padded), jnp.float32),
        grid=(n_tiles,),
        in_specs=[
            pl.BlockSpec((tb, 2), lambda i: (i, 0)),                       # x tile
            pl.BlockSpec((8, HIDDEN_PAD), const2),                         # packed side params
            pl.BlockSpec((N_HIDDEN_LAYERS, HIDDEN_PAD, HIDDEN_PAD), const3),  # W2..5
            pl.BlockSpec(memory_space=pltpu.MemorySpace.SMEM),             # b6_eff scalar
        ],
        out_specs=pl.BlockSpec((1, tb), lambda i: (0, i)),                 # lane-dense row
        compiler_params=pltpu.CompilerParams(
            dimension_semantics=("parallel",)),
    )(x, kparams["side"], kparams["wh"], kparams["b6"])

    return out.reshape(padded, 1)[:batch]


def _reference_forward(x, params):
    """Pure-JAX reference with the original (unfolded) module semantics."""
    x = x.astype(jnp.float32)
    batch = x.shape[0]
    xv = x * params["in_scale"][None, :] + params["in_offset"][None, :]
    elec = jnp.zeros((batch, N_ELECTRODES), jnp.float32)
    elec = elec.at[:, list(DATA_INPUT_INDICES)].set(xv)
    elec = elec.at[:, list(CONTROL_INDICES)].set(
        jnp.broadcast_to(params["control_voltages"][None, :],
                         (batch, len(CONTROL_INDICES))))
    h = elec
    for i in range(6):
        h = h @ params["weights"][i] + params["biases"][i]
        if i < 5:
            h = jnp.maximum(h, 0.0)
    return h * params["amplification"][0, 0]


if __name__ == "__main__":
    key = jax.random.PRNGKey(0)
    k_params, k_x1, k_x2 = jax.random.split(key, 3)

    params = init_params(k_params)
    kparams = prepare_kernel_params(params)

    # --- Small single-tile case (ring-task style batch of 2-D points in [-1, 1]).
    batch = 8
    x = jax.random.uniform(k_x1, (batch, len(DATA_INPUT_INDICES)), jnp.float32,
                           minval=-1.0, maxval=1.0)
    y = dnpu_forward(x, kparams)
    jax.block_until_ready(y)
    assert y.shape == (batch, 1) and y.dtype == jnp.float32
    y_ref = _reference_forward(x, params)
    tol = 5e-2 * (1.0 + jnp.max(jnp.abs(y_ref)))
    assert jnp.max(jnp.abs(y - y_ref)) <= tol

    # --- Multi-tile + batch-padding path (exercises n_tiles > 1 output blocks).
    batch2 = 300
    x2 = jax.random.uniform(k_x2, (batch2, len(DATA_INPUT_INDICES)), jnp.float32,
                            minval=-1.0, maxval=1.0)
    y2 = dnpu_forward(x2, kparams, batch_tile=256)
    jax.block_until_ready(y2)
    assert y2.shape == (batch2, 1) and y2.dtype == jnp.float32
    y2_ref = _reference_forward(x2, params)
    tol2 = 5e-2 * (1.0 + jnp.max(jnp.abs(y2_ref)))
    assert jnp.max(jnp.abs(y2 - y2_ref)) <= tol2

    print("KERNEL_OK")
</pallas_src>

<mosaic_0001>
module attributes {stable_mosaic.version = 11 : i64} {
  func.func @dnpu_mlp_kernel(%arg0: i32, %arg1: memref<8x2xf32, #tpu.memory_space<vmem>>, %arg2: memref<8x128xf32, #tpu.memory_space<vmem>>, %arg3: memref<4x128x128xbf16, #tpu.memory_space<vmem>>, %arg4: memref<1x1xf32, #tpu.memory_space<smem>>, %arg5: memref<1x8xf32, #tpu.memory_space<vmem>>) attributes {dimension_semantics = [#tpu.dimension_semantics<parallel>], iteration_bounds = array<i64: 1>, scalar_prefetch = 0 : i64, scratch_operands = 0 : i64, tpu.core_type = #tpu.core_type<tc>, window_params = [{transform_indices = @transform_0, window_bounds = array<i64: 8, 2>}, {pipeline_mode = #tpu.pipeline_mode<synchronous>, transform_indices = @transform_1, window_bounds = array<i64: 8, 128>}, {pipeline_mode = #tpu.pipeline_mode<synchronous>, transform_indices = @transform_2, window_bounds = array<i64: 4, 128, 128>}, {transform_indices = @transform_3, window_bounds = array<i64: 1, 1>}, {transform_indices = @transform_4, window_bounds = array<i64: 1, 8>}]} {
    %c0 = arith.constant 0 : index
    %c0_0 = arith.constant 0 : index
    %0 = vector.load %arg1[%c0, %c0_0] : memref<8x2xf32, #tpu.memory_space<vmem>>, vector<8x2xf32>
    %c0_1 = arith.constant 0 : index
    %c0_2 = arith.constant 0 : index
    %1 = vector.load %arg2[%c0_1, %c0_2] : memref<8x128xf32, #tpu.memory_space<vmem>>, vector<8x128xf32>
    %2 = vector.extract_strided_slice %1 {offsets = [0, 0], sizes = [2, 128], strides = [1, 1]} : vector<8x128xf32> to vector<2x128xf32>
    %3 = vector.extract_strided_slice %1 {offsets = [2, 0], sizes = [1, 128], strides = [1, 1]} : vector<8x128xf32> to vector<1x128xf32>
    %4 = vector.extract_strided_slice %1 {offsets = [7, 0], sizes = [1, 128], strides = [1, 1]} : vector<8x128xf32> to vector<1x128xf32>
    %5 = vector.extract_strided_slice %0 {offsets = [0, 0], sizes = [8, 1], strides = [1, 1]} : vector<8x2xf32> to vector<8x1xf32>
    %6 = vector.extract_strided_slice %2 {offsets = [0, 0], sizes = [1, 128], strides = [1, 1]} : vector<2x128xf32> to vector<1x128xf32>
    %7 = vector.broadcast %5 : vector<8x1xf32> to vector<8x128xf32>
    %8 = vector.broadcast %6 : vector<1x128xf32> to vector<8x128xf32>
    %9 = arith.mulf %7, %8 : vector<8x128xf32>
    %10 = vector.extract_strided_slice %0 {offsets = [0, 1], sizes = [8, 1], strides = [1, 1]} : vector<8x2xf32> to vector<8x1xf32>
    %11 = vector.extract_strided_slice %2 {offsets = [1, 0], sizes = [1, 128], strides = [1, 1]} : vector<2x128xf32> to vector<1x128xf32>
    %12 = vector.broadcast %10 : vector<8x1xf32> to vector<8x128xf32>
    %13 = vector.broadcast %11 : vector<1x128xf32> to vector<8x128xf32>
    %14 = arith.mulf %12, %13 : vector<8x128xf32>
    %15 = arith.addf %9, %14 : vector<8x128xf32>
    %16 = vector.broadcast %3 : vector<1x128xf32> to vector<8x128xf32>
    %17 = arith.addf %15, %16 : vector<8x128xf32>
    %cst = arith.constant 0.000000e+00 : f32
    %18 = vector.broadcast %cst : f32 to vector<8x128xf32>
    %19 = arith.maximumf %17, %18 : vector<8x128xf32>
    %20 = arith.truncf %19 : vector<8x128xf32> to vector<8x128xbf16>
    %c0_3 = arith.constant 0 : index
    %c0_4 = arith.constant 0 : index
    %c0_5 = arith.constant 0 : index
    %21 = vector.load %arg3[%c0_3, %c0_4, %c0_5] : memref<4x128x128xbf16, #tpu.memory_space<vmem>>, vector<1x128x128xbf16>
    %22 = vector.shape_cast %21 : vector<1x128x128xbf16> to vector<128x128xbf16>
    %cst_6 = arith.constant dense<0.000000e+00> : vector<8x128xf32>
    %23 = tpu.matmul %20, %22, %cst_6 {dimension_numbers = #tpu.dot_dimension_numbers<[1], [0], [0], [1], [0, 0, 1, 1], [], []>} : vector<8x128xbf16>, vector<128x128xbf16>, vector<8x128xf32> -> vector<8x128xf32>
    %24 = vector.extract_strided_slice %1 {offsets = [3, 0], sizes = [1, 128], strides = [1, 1]} : vector<8x128xf32> to vector<1x128xf32>
    %25 = vector.broadcast %24 : vector<1x128xf32> to vector<8x128xf32>
    %26 = arith.addf %23, %25 : vector<8x128xf32>
    %cst_7 = arith.constant 0.000000e+00 : f32
    %27 = vector.broadcast %cst_7 : f32 to vector<8x128xf32>
    %28 = arith.maximumf %26, %27 : vector<8x128xf32>
    %29 = arith.truncf %28 : vector<8x128xf32> to vector<8x128xbf16>
    %c1 = arith.constant 1 : index
    %c0_8 = arith.constant 0 : index
    %c0_9 = arith.constant 0 : index
    %30 = vector.load %arg3[%c1, %c0_8, %c0_9] : memref<4x128x128xbf16, #tpu.memory_space<vmem>>, vector<1x128x128xbf16>
    %31 = vector.shape_cast %30 : vector<1x128x128xbf16> to vector<128x128xbf16>
    %cst_10 = arith.constant dense<0.000000e+00> : vector<8x128xf32>
    %32 = tpu.matmul %29, %31, %cst_10 {dimension_numbers = #tpu.dot_dimension_numbers<[1], [0], [0], [1], [0, 0, 1, 1], [], []>} : vector<8x128xbf16>, vector<128x128xbf16>, vector<8x128xf32> -> vector<8x128xf32>
    %33 = vector.extract_strided_slice %1 {offsets = [4, 0], sizes = [1, 128], strides = [1, 1]} : vector<8x128xf32> to vector<1x128xf32>
    %34 = vector.broadcast %33 : vector<1x128xf32> to vector<8x128xf32>
    %35 = arith.addf %32, %34 : vector<8x128xf32>
    %cst_11 = arith.constant 0.000000e+00 : f32
    %36 = vector.broadcast %cst_11 : f32 to vector<8x128xf32>
    %37 = arith.maximumf %35, %36 : vector<8x128xf32>
    %38 = arith.truncf %37 : vector<8x128xf32> to vector<8x128xbf16>
    %c2 = arith.constant 2 : index
    %c0_12 = arith.constant 0 : index
    %c0_13 = arith.constant 0 : index
    %39 = vector.load %arg3[%c2, %c0_12, %c0_13] : memref<4x128x128xbf16, #tpu.memory_space<vmem>>, vector<1x128x128xbf16>
    %40 = vector.shape_cast %39 : vector<1x128x128xbf16> to vector<128x128xbf16>
    %cst_14 = arith.constant dense<0.000000e+00> : vector<8x128xf32>
    %41 = tpu.matmul %38, %40, %cst_14 {dimension_numbers = #tpu.dot_dimension_numbers<[1], [0], [0], [1], [0, 0, 1, 1], [], []>} : vector<8x128xbf16>, vector<128x128xbf16>, vector<8x128xf32> -> vector<8x128xf32>
    %42 = vector.extract_strided_slice %1 {offsets = [5, 0], sizes = [1, 128], strides = [1, 1]} : vector<8x128xf32> to vector<1x128xf32>
    %43 = vector.broadcast %42 : vector<1x128xf32> to vector<8x128xf32>
    %44 = arith.addf %41, %43 : vector<8x128xf32>
    %cst_15 = arith.constant 0.000000e+00 : f32
    %45 = vector.broadcast %cst_15 : f32 to vector<8x128xf32>
    %46 = arith.maximumf %44, %45 : vector<8x128xf32>
    %47 = arith.truncf %46 : vector<8x128xf32> to vector<8x128xbf16>
    %c3 = arith.constant 3 : index
    %c0_16 = arith.constant 0 : index
    %c0_17 = arith.constant 0 : index
    %48 = vector.load %arg3[%c3, %c0_16, %c0_17] : memref<4x128x128xbf16, #tpu.memory_space<vmem>>, vector<1x128x128xbf16>
    %49 = vector.shape_cast %48 : vector<1x128x128xbf16> to vector<128x128xbf16>
    %cst_18 = arith.constant dense<0.000000e+00> : vector<8x128xf32>
    %50 = tpu.matmul %47, %49, %cst_18 {dimension_numbers = #tpu.dot_dimension_numbers<[1], [0], [0], [1], [0, 0, 1, 1], [], []>} : vector<8x128xbf16>, vector<128x128xbf16>, vector<8x128xf32> -> vector<8x128xf32>
    %51 = vector.extract_strided_slice %1 {offsets = [6, 0], sizes = [1, 128], strides = [1, 1]} : vector<8x128xf32> to vector<1x128xf32>
    %52 = vector.broadcast %51 : vector<1x128xf32> to vector<8x128xf32>
    %53 = arith.addf %50, %52 : vector<8x128xf32>
    %cst_19 = arith.constant 0.000000e+00 : f32
    %54 = vector.broadcast %cst_19 : f32 to vector<8x128xf32>
    %55 = arith.maximumf %53, %54 : vector<8x128xf32>
    %56 = vector.broadcast %4 : vector<1x128xf32> to vector<8x128xf32>
    %57 = arith.mulf %55, %56 : vector<8x128xf32>
    %cst_20 = arith.constant dense<0.000000e+00> : vector<8xf32>
    %58 = vector.multi_reduction <add>, %57, %cst_20 [1] : vector<8x128xf32> to vector<8xf32>
    %c0_21 = arith.constant 0 : index
    %c0_22 = arith.constant 0 : index
    %59 = memref.load %arg4[%c0_21, %c0_22] : memref<1x1xf32, #tpu.memory_space<smem>>
    %60 = vector.broadcast %59 : f32 to vector<8xf32>
    %61 = arith.addf %58, %60 : vector<8xf32>
    %62 = vector.shape_cast %61 : vector<8xf32> to vector<1x8xf32>
    %c0_23 = arith.constant 0 : index
    %c0_24 = arith.constant 0 : index
    %63 = vector.load %arg5[%c0_23, %c0_24] : memref<1x8xf32, #tpu.memory_space<vmem>>, vector<1x8xf32>
    tpu.vector_store %arg5[%c0_23, %c0_24], %62 {strides = array<i32>} : memref<1x8xf32, #tpu.memory_space<vmem>>, vector<1x8xf32>,
    return
  }
  func.func @transform_0(%arg0: i32) -> (i32, i32) {
    %c0_i32 = arith.constant 0 : i32
    %c0_i32_0 = arith.constant 0 : i32
    return %arg0, %c0_i32 : i32, i32
  }
  func.func @transform_1(%arg0: i32) -> (i32, i32) {
    %c0_i32 = arith.constant 0 : i32
    %c0_i32_0 = arith.constant 0 : i32
    %c0_i32_1 = arith.constant 0 : i32
    return %c0_i32, %c0_i32_0 : i32, i32
  }
  func.func @transform_2(%arg0: i32) -> (i32, i32, i32) {
    %c0_i32 = arith.constant 0 : i32
    %c0_i32_0 = arith.constant 0 : i32
    %c0_i32_1 = arith.constant 0 : i32
    %c0_i32_2 = arith.constant 0 : i32
    return %c0_i32, %c0_i32_0, %c0_i32_1 : i32, i32, i32
  }
  func.func @transform_3(%arg0: i32) -> (i32, i32) {
    %c0_i32 = arith.constant 0 : i32
    %c0_i32_0 = arith.constant 0 : i32
    %c0_i32_1 = arith.constant 0 : i32
    return %c0_i32, %c0_i32_0 : i32, i32
  }
  func.func @transform_4(%arg0: i32) -> (i32, i32) {
    %c0_i32 = arith.constant 0 : i32
    %c0_i32_0 = arith.constant 0 : i32
    return %c0_i32, %arg0 : i32, i32
  }
}

</mosaic_0001>

<bundles_post_ra>
// kernel: dnpu_forward.1
= control target key start
LH: loop header
LB: loop body
LE: loop exit
PB: predicated region body
PF: predicated region fallthrough
CT: control target
= control target key end

     0   :  { %10 = vsyncpa [#allocation4], 0  ;;  %s885_s0 = inlined_call_operand.vmem [shape: f32[8,2], index: 0, kind: input, shape index: {}]   ;;  %s886_s1 = inlined_call_operand.vmem [shape: f32[8,128], index: 1, kind: input, shape index: {}]   ;;  %s887_s2 = inlined_call_operand.hbm [shape: bf16[4,128,128], index: 2, kind: input, shape index: {}]   ;;  %s888_s3 = inlined_call_operand.<no memory space> [shape: f32[1,1], index: 3, kind: input, shape index: {}]   ;;  %s889_s4 = inlined_call_operand.hbm [shape: f32[1,8], index: 4, kind: output, shape index: {}]  }
   0x1   :  { %11 = vsyncpa [#allocation5], 0  ;;  %s774_s15 = smov [#allocation3]  }
   0x2   :  { %s21_s16 = sshll.u32 %s774_s15, 4  ;;  %s22_s16 = int_to_ptr.vmem [resolvable:$true] %s21_s16 }
   0x3   :  { %s738_s17 = scalar_lea.vmem %s22_s16, 4096  ;;  %p743_p1 = scmp.lt.s32.totalorder %s22_s16, %s22_s16 }
   0x4   :  { %p739_p0 = scmp.ne.s32.totalorder %s22_s16, %s738_s17  ;;  %p744_p2 = scmp.lt.s32.totalorder %s738_s17, %s738_s17 }
   0x6   :  { %p745_p3 = por %p744_p2, %p743_p1 }
   0x8   :  { %p746_p4 = pnand %p745_p3, %p739_p0 }
   0xa   :  { %749 = shalt.err (!%p746_p4)
}
   0xb   :  { %s775_s18 = smov 64   ;;  %s776_s19 = smov 4  }
   0xc   :  { %27 = dma.hbm_to_vmem [thread:$0]  %s887_s2, 4096, %s22_s16, [#allocation4], %s775_s18, %s775_s18, %s776_s19  }
   0xd   :  { %770 = dma.done.wait [#allocation4], 4096  }
   0xe   :  { %771 = vsyncadd [#allocation4], 4294963200  ;;  %v777_v0 = vmov 0   ;;  %v778_v1 = vmov 0.0   ;;  %v34_v2 = vld [vmem:[%s885_s0] sm:$0xff]  ;;  %v698_v3 = vld [vmem:[#allocation3 + $0x38] sm:$0xff]   ;;  %v41_v18 = vlaneseq }
   0xf   :  { %696 = vset.pattern.permute.xlu0 %v777_v0  ;;  %608 = vmatprep.subr.bf16.mxu0 %v778_v1  ;;  %v699_v4 = vld [vmem:[#allocation3 + $0x30] sm:$0xff]   ;;  %v779_v5 = vmov 1   ;;  %v700_v6 = vld [vmem:[#allocation3 + $0x28] sm:$0xff]   ;;  %vm780_vm0 = vmmov 0   ;;  %v701_v7 = vld [vmem:[#allocation3 + $0x20] sm:$0xff]   ;;  %s781_s25 = smov [#allocation6]  }
  0x10   :  { %628 = vmatprep.subr.bf16.mxu1 %v778_v1  ;;  %38 = vperm.xlu0 %696, %v34_v2   ;;  %v706_v8 = vld [vmem:[#allocation3 + $0x78] sm:$0xff]   ;;  %v707_v10 = vld [vmem:[#allocation3 + $0x70] sm:$0xff]   ;;  %v708_v11 = vld [vmem:[#allocation3 + $0x68] sm:$0xff]   ;;  %v834_v19 = vshrl.u32 %v41_v18, 7  ;;  %s531_s26 = sshll.u32 %s781_s25, 4  ;;  %vm523_vm1 = vcmask 57344   ;;  %s532_s26 = int_to_ptr.vmem [resolvable:$true] %s531_s26 }
  0x11   :  { %609 = vmatpush3.bf16.msra.mxu0 %v698_v3  ;;  %624 = vmatprep.mubr.msk.bf16.mxu0 %vm780_vm0, %v778_v1  ;;  %v702_v9 = vld [vmem:[#allocation3 + $0x18] sm:$0xff]   ;;  %v703_v12 = vld [vmem:[#allocation3 + $0x10] sm:$0xff]   ;;  %v709_v13 = vld [vmem:[#allocation3 + $0x60] sm:$0xff]   ;;  %s750_s27 = scalar_lea.vmem %s532_s26, 16  ;;  %s754_s28 = scalar_lea.vmem %s532_s26, 32 }
  0x12   :  { %610 = vmatprep.subr.bf16.mxu0 %v778_v1  ;;  %644 = vmatprep.mubr.msk.bf16.mxu1 %vm780_vm0, %v778_v1  ;;  %v704_v14 = vld [vmem:[#allocation3 + $0x8] sm:$0xff]   ;;  %v710_v15 = vld [vmem:[#allocation3 + $0x58] sm:$0xff]   ;;  %v705_v16 = vld [vmem:[#allocation3] sm:$0xff]   ;;  %v43_v20 = vsub.s32 0, %v834_v19  ;;  %v52_v21 = vsub.s32 1, %v834_v19  ;;  %v58_v26 = vsub.s32 2, %v834_v19  ;;  %p751_p5 = scmp.ne.s32.totalorder %s532_s26, %s750_s27  ;;  %p755_p6 = scmp.lt.s32.totalorder %s532_s26, %s532_s26 }
  0x13   :  { %629 = vmatpush3.bf16.msra.mxu1 %v706_v8  ;;  %v711_v17 = vld [vmem:[#allocation3 + $0x50] sm:$0xff]   ;;  %v841_v22 = vld [vmem:[%s886_s1] sm:$0xff]  ;;  %v712_v35 = vld [vmem:[#allocation3 + $0x48] sm:$0xff]   ;;  %v81_v43 = vsub.s32 3, %v834_v19  ;;  %v192_v60 = vsub.s32 4, %v834_v19  ;;  %v303_v8 = vsub.s32 5, %v834_v19  ;;  %p756_p7 = scmp.lt.s32.totalorder %s754_s28, %s750_s27 }
  0x14   :  { %697 = vset.pattern.permute.xlu0 %v779_v5  ;;  %630 = vmatprep.subr.bf16.mxu1 %v778_v1  ;;  %v44_v24 = vrot.slane %v841_v22, %v43_v20  ;;  %v53_v25 = vrot.slane %v841_v22, %v52_v21  ;;  %v59_v29 = vrot.slane %v841_v22, %v58_v26  ;;  %v713_v36 = vld [vmem:[#allocation3 + $0x40] sm:$0xff]   ;;  %v714_v37 = vld [vmem:[#allocation3 + $0xb8] sm:$0xff]   ;;  %v715_v38 = vld [vmem:[#allocation3 + $0xb0] sm:$0xff]  }
  0x15   :  { %47 = vperm.xlu0 %697, %v34_v2   ;;  %611 = vmatpush3.bf16.msra.mxu0 %v699_v4  ;;  %v716_v39 = vld [vmem:[#allocation3 + $0xa8] sm:$0xff]   ;;  %v717_v40 = vld [vmem:[#allocation3 + $0xa0] sm:$0xff]   ;;  %v718_v41 = vld [vmem:[#allocation3 + $0x98] sm:$0xff]   ;;  %v82_v44 = vrot.slane %v841_v22, %v81_v43  ;;  %v193_v61 = vrot.slane %v841_v22, %v192_v60  ;;  %p757_p8 = por %p756_p7, %p755_p6 }
  0x16   :  { %612 = vmatprep.subr.bf16.mxu0 %v778_v1  ;;  %v719_v42 = vld [vmem:[#allocation3 + $0x90] sm:$0xff]   ;;  %v720_v52 = vld [vmem:[#allocation3 + $0x88] sm:$0xff]   ;;  %v721_v53 = vld [vmem:[#allocation3 + $0x80] sm:$0xff]  }
  0x17   :  { %631 = vmatpush3.bf16.msra.mxu1 %v707_v10  ;;  %v722_v54 = vld [vmem:[#allocation3 + $0xf8] sm:$0xff]   ;;  %v723_v55 = vld [vmem:[#allocation3 + $0xf0] sm:$0xff]   ;;  %v724_v56 = vld [vmem:[#allocation3 + $0xe8] sm:$0xff]   ;;  %p758_p9 = pnand %p757_p8, %p751_p5 }
  0x18   :  { %632 = vmatprep.subr.bf16.mxu1 %v778_v1  ;;  %v725_v57 = vld [vmem:[#allocation3 + $0xe0] sm:$0xff]   ;;  %v726_v58 = vld [vmem:[#allocation3 + $0xd8] sm:$0xff]   ;;  %v727_v59 = vld [vmem:[#allocation3 + $0xd0] sm:$0xff]  }
  0x19   :  { %613 = vmatpush3.bf16.msra.mxu0 %v700_v6  ;;  %v728_v6 = vld [vmem:[#allocation3 + $0xc8] sm:$0xff]  }
  0x1a   :  { %614 = vmatprep.subr.bf16.mxu0 %v778_v1 }
  0x1b   :  { %633 = vmatpush3.bf16.msra.mxu1 %v708_v11 }
  0x1c   :  { %634 = vmatprep.subr.bf16.mxu1 %v778_v1 }
  0x1d   :  { %615 = vmatpush3.bf16.msra.mxu0 %v701_v7  ;;  %v729_v7 = vld [vmem:[#allocation3 + $0xc0] sm:$0xff]  }
  0x1e   :  { %616 = vmatprep.subr.bf16.mxu0 %v778_v1 }
  0x1f   :  { %635 = vmatpush3.bf16.msra.mxu1 %v709_v13 }
  0x20   :  { %636 = vmatprep.subr.bf16.mxu1 %v778_v1 }
  0x21   :  { %617 = vmatpush3.bf16.msra.mxu0 %v702_v9  ;;  %v304_v9 = vrot.slane %v841_v22, %v303_v8 }
  0x22   :  { %618 = vmatprep.subr.bf16.mxu0 %v778_v1 }
  0x23   :  { %637 = vmatpush3.bf16.msra.mxu1 %v710_v15 }
  0x24   :  { %638 = vmatprep.subr.bf16.mxu1 %v778_v1 }
  0x25   :  { %619 = vmatpush3.bf16.msra.mxu0 %v703_v12 }
  0x26   :  { %620 = vmatprep.subr.bf16.mxu0 %v778_v1 }
  0x27   :  { %639 = vmatpush3.bf16.msra.mxu1 %v711_v17  ;;  %v414_v17 = vsub.s32 6, %v834_v19 }
  0x28   :  { %640 = vmatprep.subr.bf16.mxu1 %v778_v1 }
  0x29   :  { %621 = vmatpush3.bf16.msra.mxu0 %v704_v14  ;;  %v415_v20 = vrot.slane %v841_v22, %v414_v17 }
  0x2a   :  { %622 = vmatprep.subr.bf16.mxu0 %v778_v1 }
  0x2b   :  { %641 = vmatpush3.bf16.msra.mxu1 %v712_v35 }
  0x2c   :  { %642 = vmatprep.subr.bf16.mxu1 %v778_v1 }
  0x2d   :  { %623 = vmatpush3.bf16.msra.mxu0 %v705_v16 }
  0x2e   :  { %648 = vmatprep.subr.bf16.mxu0 %v778_v1 }
  0x2f   :  { %643 = vmatpush3.bf16.msra.mxu1 %v713_v36 }
  0x30   :  { %668 = vmatprep.subr.bf16.mxu1 %v778_v1 }
  0x8b   :  { %v39_v23 = vpop.permute.xlu0 %38 }
  0x8c   :  { %v45_v28 = vmul.f32 %v44_v24, %v39_v23 }
  0x90   :  { %v48_v27 = vpop.permute.xlu0 %47 }
  0x91   :  { %v54_v30 = vmul.f32 %v53_v25, %v48_v27 }
  0x93   :  { %v55_v31 = vadd.f32 %v54_v30, %v45_v28  ;;  %v517_v30 = vand.u32 127, %v41_v18 }
  0x95   :  { %v60_v32 = vadd.f32 %v59_v29, %v55_v31  ;;  %v513_v31 = vstv %s888_s3 }
  0x97   :  { %v61_v33 = vmax.f32 %v60_v32, 0.0  ;;  %v520_v32 = vsub.s32 %v517_v30, %v834_v19 }
  0x99   :  { %v62_v34 = vpack.c.bf16 %v61_v33, %v61_v33 }
  0x9b   :  { %625 = vmatmul.mubr.bf16.vlgmr.msra.gmra.mxu0 %v62_v34 }
  0x9c   :  { %664 = vmatprep.mubr.msk.bf16.mxu0 %vm780_vm0, %v778_v1  ;;  %649 = vmatpush3.bf16.msra.mxu0 %v714_v37 }
  0x9d   :  { %650 = vmatprep.subr.bf16.mxu0 %v778_v1 }
  0xa0   :  { %651 = vmatpush3.bf16.msra.mxu0 %v715_v38 }
  0xa1   :  { %652 = vmatprep.subr.bf16.mxu0 %v778_v1 }
  0xa4   :  { %653 = vmatpush3.bf16.msra.mxu0 %v716_v39 }
  0xa5   :  { %654 = vmatprep.subr.bf16.mxu0 %v778_v1 }
  0xa8   :  { %655 = vmatpush3.bf16.msra.mxu0 %v717_v40 }
  0xa9   :  { %656 = vmatprep.subr.bf16.mxu0 %v778_v1 }
  0xac   :  { %657 = vmatpush3.bf16.msra.mxu0 %v718_v41 }
  0xad   :  { %658 = vmatprep.subr.bf16.mxu0 %v778_v1 }
  0xb0   :  { %659 = vmatpush3.bf16.msra.mxu0 %v719_v42 }
  0xb1   :  { %660 = vmatprep.subr.bf16.mxu0 %v778_v1 }
  0xb4   :  { %661 = vmatpush3.bf16.msra.mxu0 %v720_v52 }
  0xb5   :  { %662 = vmatprep.subr.bf16.mxu0 %v778_v1 }
  0xb8   :  { %663 = vmatpush3.bf16.msra.mxu0 %v721_v53 }
 0x15b   :  { %v165_v45 = vpop.f32.mrf.mxu0 }
 0x15c   :  { %v166_v46 = vadd.f32 %v165_v45, %v82_v44 }
 0x15d   :  { %v626_v47 = vpop.f32.mrf.mxu0 }
 0x15e   :  { %v171_v48 = vmax.f32 %v166_v46, 0.0 }
 0x15f   :  { %v168_v49 = vpop.f32.mrf.mxu0 }
 0x160   :  { %v172_v50 = vpack.c.bf16 %v171_v48, %v171_v48 }
 0x161   :  { %v627_v51 = vpop.f32.mrf.mxu0 }
 0x162   :  { %645 = vmatmul.mubr.bf16.vlgmr.msra.gmra.mxu1 %v172_v50 }
 0x163   :  { %684 = vmatprep.mubr.msk.bf16.mxu1 %vm780_vm0, %v778_v1  ;;  %669 = vmatpush3.bf16.msra.mxu1 %v722_v54 }
 0x164   :  { %670 = vmatprep.subr.bf16.mxu1 %v778_v1 }
 0x167   :  { %671 = vmatpush3.bf16.msra.mxu1 %v723_v55 }
 0x168   :  { %672 = vmatprep.subr.bf16.mxu1 %v778_v1 }
 0x16b   :  { %673 = vmatpush3.bf16.msra.mxu1 %v724_v56 }
 0x16c   :  { %674 = vmatprep.subr.bf16.mxu1 %v778_v1 }
 0x16f   :  { %675 = vmatpush3.bf16.msra.mxu1 %v725_v57 }
 0x170   :  { %676 = vmatprep.subr.bf16.mxu1 %v778_v1 }
 0x173   :  { %677 = vmatpush3.bf16.msra.mxu1 %v726_v58 }
 0x174   :  { %678 = vmatprep.subr.bf16.mxu1 %v778_v1 }
 0x177   :  { %679 = vmatpush3.bf16.msra.mxu1 %v727_v59 }
 0x178   :  { %680 = vmatprep.subr.bf16.mxu1 %v778_v1 }
 0x17b   :  { %681 = vmatpush3.bf16.msra.mxu1 %v728_v6 }
 0x17c   :  { %682 = vmatprep.subr.bf16.mxu1 %v778_v1  ;;  %v507_v1 = vsub.s32 7, %v834_v19 }
 0x17e   :  { %v508_v24 = vrot.slane %v841_v22, %v507_v1 }
 0x17f   :  { %683 = vmatpush3.bf16.msra.mxu1 %v729_v7 }
 0x222   :  { %v276_v62 = vpop.f32.mrf.mxu1 }
 0x223   :  { %v277_v63 = vadd.f32 %v276_v62, %v193_v61 }
 0x224   :  { %v646_v0 = vpop.f32.mrf.mxu1 }
 0x225   :  { %v282_v2 = vmax.f32 %v277_v63, 0.0 }
 0x226   :  { %v279_v3 = vpop.f32.mrf.mxu1 }
 0x227   :  { %v283_v4 = vpack.c.bf16 %v282_v2, %v282_v2 }
 0x228   :  { %v647_v5 = vpop.f32.mrf.mxu1 }
 0x229   :  { %665 = vmatmul.mubr.bf16.vlgmr.msra.gmra.mxu0 %v283_v4 }
 0x2e9   :  { %v387_v10 = vpop.f32.mrf.mxu0 }
 0x2ea   :  { %v388_v11 = vadd.f32 %v387_v10, %v304_v9 }
 0x2eb   :  { %v666_v12 = vpop.f32.mrf.mxu0 }
 0x2ec   :  { %v393_v13 = vmax.f32 %v388_v11, 0.0 }
 0x2ed   :  { %v390_v14 = vpop.f32.mrf.mxu0 }
 0x2ee   :  { %v394_v15 = vpack.c.bf16 %v393_v13, %v393_v13 }
 0x2ef   :  { %v667_v16 = vpop.f32.mrf.mxu0 }
 0x2f0   :  { %685 = vmatmul.mubr.bf16.vlgmr.msra.gmra.mxu1 %v394_v15 }
 0x3b0   :  { %v498_v21 = vpop.f32.mrf.mxu1 }
 0x3b1   :  { %v499_v23 = vadd.f32 %v498_v21, %v415_v20 }
 0x3b2   :  { %v686_v25 = vpop.f32.mrf.mxu1 }
 0x3b3   :  { %v504_v26 = vmax.f32 %v499_v23, 0.0 }
 0x3b4   :  { %v501_v27 = vpop.f32.mrf.mxu1 }
 0x3b5   :  { %v509_v28 = vmul.f32 %v508_v24, %v504_v26 }
 0x3b6   :  { %v687_v29 = vpop.f32.mrf.mxu1 }
 0x3b7   :  { %510 = vadd.xlane.f32.xlu1 %v509_v28 }
 0x440   :  { %v511_v33 = vpop.xlane.xlu1 %510 }
 0x441   :  { %v514_v34 = vadd.f32 %v513_v31, %v511_v33 }
 0x443   :  { %v521_v22 = vrot.slane %v514_v34, %v520_v32 }
 0x445   :  { %524 = vst.msk [vmem:[#allocation6] sm:$0x1] %vm523_vm1, %v521_v22 }
 0x446   :  { %761 = shalt.err (!%p758_p9)
}
 0x447   :  { %534 = dma.vmem_to_hbm [thread:$0]  %s532_s26, 16, %s889_s4, [#allocation5]  }
 0x448   :  { %772 = dma.done.wait [#allocation5], 16  }
 0x449   :  { %773 = vsyncadd [#allocation5], 4294967280 }
 0x44a   :  { %538 = vsyncpa [#allocation4], 1 }
 0x44b   :  { %539 = vsyncpa [#allocation5], 1 }

</bundles_post_ra>
